<compile_context>
chip_gen: v7x
topology: tpu7x:2x2x1
jax: 0.10.0
libtpu: 0.0.40
codegen_flags: <defaults>
</compile_context>

<pallas_src>
import functools

import jax
import jax.numpy as jnp
from jax.experimental import pallas as pl
from jax.experimental.pallas import tpu as pltpu


def _dws_kernel(x_ref, w_ref, *rest, W, pointwise):
    """One batch element: depthwise 3x3 (+ optional pointwise 1x1).

    x_ref: (1, Cin, H*W)      activations, channels on sublanes, spatial on lanes
    w_ref: (3, 3, Cin, H*W)   mask-folded depthwise tap weights (see wrapper)
    rest : (wp_ref, o_ref) if pointwise else (o_ref,)
           wp_ref: (Cout, Cin) pointwise weight; o_ref: (1, Cout, H*W)
    """
    if pointwise:
        wp_ref, o_ref = rest
    else:
        (o_ref,) = rest

    x = x_ref[0]                                    # (Cin, H*W) float32

    # Three dx-shifted views, shared across all three dy tap-rows (4 circular
    # shifts total instead of 8).  Shifts are circular: any contribution that
    # would read outside the image (or wrap across a row) is zeroed because the
    # folded weights are zero there.
    xs = (jnp.roll(x, 1, axis=1),                   # x[c, p-1]
          x,                                        # x[c, p  ]
          jnp.roll(x, -1, axis=1))                  # x[c, p+1]

    acc = None
    for i, oy in enumerate((-1, 0, 1)):
        g = (w_ref[i, 0] * xs[0] +
             w_ref[i, 1] * xs[1] +
             w_ref[i, 2] * xs[2])                   # (Cin, H*W)
        if oy != 0:
            g = jnp.roll(g, -oy * W, axis=1)        # one dy shift per tap row
        acc = g if acc is None else acc + g

    if pointwise:
        out = jnp.dot(wp_ref[...], acc.astype(wp_ref.dtype),
                      preferred_element_type=jnp.float32)   # (Cout, H*W) on the MXU
        o_ref[0] = out.astype(o_ref.dtype)
    else:
        o_ref[0] = acc.astype(o_ref.dtype)


def _fold_depthwise_weights(w_depthwise, H, W):
    """(Cin, 1, 3, 3) torch depthwise weight -> (3, 3, Cin, H*W) folded tap weights.

    For tap (oy, ox) the per-channel weight is broadcast over all output positions,
    zeroed wherever the tap would read outside the zero-padded image (this also
    kills the row-to-row wrap of the flattened spatial index), and pre-rolled by
    oy*W so the kernel can apply the dy shift once per tap row after summing the
    three dx taps.  All broadcast/mask work is hoisted out of the kernel.
    """
    C = w_depthwise.shape[0]
    w = jnp.asarray(w_depthwise, jnp.float32).reshape(C, 3, 3)
    HW = H * W
    yy = jnp.arange(H)[:, None]                     # (H, 1)
    xx = jnp.arange(W)[None, :]                     # (1, W)
    rows = []
    for oy in (-1, 0, 1):
        cols = []
        for ox in (-1, 0, 1):
            valid = ((yy + oy >= 0) & (yy + oy < H) &
                     (xx + ox >= 0) & (xx + ox < W)).astype(jnp.float32)   # (H, W)
            wm = w[:, oy + 1, ox + 1][:, None] * valid.reshape(1, HW)      # (Cin, HW)
            cols.append(jnp.roll(wm, oy * W, axis=1))                      # pre-roll dy
        rows.append(jnp.stack(cols, axis=0))
    return jnp.stack(rows, axis=0)                  # (3, 3, Cin, HW)


def dws_conv(x_nchw, w_depthwise, w_pointwise=None, *, matmul_dtype=jnp.float32):
    """DWSconv forward.

    x_nchw:      (N, Cin, H, W) float32            (PyTorch NCHW layout)
    w_depthwise: (Cin, 1, 3, 3)                    (torch Conv2d groups=Cin weight)
    w_pointwise: (Cout, Cin, 1, 1) or None         (torch 1x1 Conv2d weight)
    matmul_dtype: operand dtype for the pointwise matmul (jnp.bfloat16 on v6e/v7x
                  halves weight traffic / doubles MXU rate; accumulation stays f32).
    """
    N, Cin, H, W = x_nchw.shape
    assert w_depthwise.shape[-2:] == (3, 3), (
        "only kernel_size=3 / padding=1 / stride=1 is implemented")
    HW = H * W
    pointwise = w_pointwise is not None
    Cout = w_pointwise.shape[0] if pointwise else Cin

    # NCHW -> (N, Cin, H*W): pure reshape, no HBM transpose around the kernel.
    x2 = jnp.asarray(x_nchw, jnp.float32).reshape(N, Cin, HW)
    w_dw = _fold_depthwise_weights(w_depthwise, H, W)

    inputs = [x2, w_dw]
    in_specs = [
        pl.BlockSpec((1, Cin, HW), lambda n: (n, 0, 0)),
        pl.BlockSpec((3, 3, Cin, HW), lambda n: (0, 0, 0, 0)),
    ]
    if pointwise:
        inputs.append(jnp.asarray(w_pointwise).reshape(Cout, Cin).astype(matmul_dtype))
        in_specs.append(pl.BlockSpec((Cout, Cin), lambda n: (0, 0)))

    kernel = functools.partial(_dws_kernel, W=W, pointwise=pointwise)

    out3 = pl.pallas_call(
        kernel,
        out_shape=jax.ShapeDtypeStruct((N, Cout, HW), jnp.float32),
        grid_spec=pltpu.PrefetchScalarGridSpec(
            num_scalar_prefetch=0,
            grid=(N,),
            in_specs=in_specs,
            out_specs=pl.BlockSpec((1, Cout, HW), lambda n: (n, 0, 0)),
        ),
        compiler_params=pltpu.CompilerParams(
            dimension_semantics=("parallel",)),
    )(*inputs)

    return out3.reshape(N, Cout, H, W)


def reference_forward(x_nchw, w_depthwise, w_pointwise=None):
    """Pure-XLA reference with torch.nn.Conv2d semantics (stride=1, pad=1, no bias)."""
    Cin = x_nchw.shape[1]
    out = jax.lax.conv_general_dilated(
        jnp.asarray(x_nchw, jnp.float32), jnp.asarray(w_depthwise, jnp.float32),
        window_strides=(1, 1), padding=((1, 1), (1, 1)),
        dimension_numbers=("NCHW", "OIHW", "NCHW"),
        feature_group_count=Cin, precision=jax.lax.Precision.HIGHEST)
    if w_pointwise is not None:
        out = jax.lax.conv_general_dilated(
            out, jnp.asarray(w_pointwise, jnp.float32),
            window_strides=(1, 1), padding=((0, 0), (0, 0)),
            dimension_numbers=("NCHW", "OIHW", "NCHW"),
            precision=jax.lax.Precision.HIGHEST)
    return out


if __name__ == "__main__":
    key = jax.random.PRNGKey(0)
    kx, kd, kp = jax.random.split(key, 3)

    # Small shapes, picked lane/sublane friendly: Cin multiple of 8 (sublanes),
    # H*W multiple of 128 (lanes).
    N, nin, nout, H, W = 2, 8, 16, 16, 16
    x = jax.random.normal(kx, (N, nin, H, W), dtype=jnp.float32)
    w_dw = (0.2 * jax.random.normal(kd, (nin, 1, 3, 3))).astype(jnp.float32)
    w_pw = (0.2 * jax.random.normal(kp, (nout, nin, 1, 1))).astype(jnp.float32)

    # 1) depthwise + pointwise (separable conv), f32 matmul.
    out = jax.block_until_ready(dws_conv(x, w_dw, w_pw))
    ref = jax.block_until_ready(reference_forward(x, w_dw, w_pw))
    assert out.shape == (N, nout, H, W)
    assert jnp.allclose(out, ref, atol=1e-4, rtol=1e-4), "pointwise=True mismatch"

    # 2) depthwise only (the module's default: pointwise=False).
    out_dw = jax.block_until_ready(dws_conv(x, w_dw, None))
    ref_dw = jax.block_until_ready(reference_forward(x, w_dw, None))
    assert out_dw.shape == (N, nin, H, W)
    assert jnp.allclose(out_dw, ref_dw, atol=1e-4, rtol=1e-4), "pointwise=False mismatch"

    # 3) bf16 pointwise weights / f32 accumulation (v6e / v7x MXU path).
    out_bf16 = jax.block_until_ready(dws_conv(x, w_dw, w_pw, matmul_dtype=jnp.bfloat16))
    assert jnp.allclose(out_bf16, ref, atol=5e-2, rtol=5e-2), "bf16 matmul path mismatch"

    print("KERNEL_OK")
</pallas_src>

<mosaic_0001>
module attributes {stable_mosaic.version = 11 : i64} {
  func.func @_dws_kernel(%arg0: i32, %arg1: memref<1x8x256xf32, #tpu.memory_space<vmem>>, %arg2: memref<3x3x8x256xf32, #tpu.memory_space<vmem>>, %arg3: memref<16x8xf32, #tpu.memory_space<vmem>>, %arg4: memref<1x16x256xf32, #tpu.memory_space<vmem>>) attributes {dimension_semantics = [#tpu.dimension_semantics<parallel>], iteration_bounds = array<i64: 2>, scalar_prefetch = 0 : i64, scratch_operands = 0 : i64, tpu.core_type = #tpu.core_type<tc>, window_params = [{transform_indices = @transform_0, window_bounds = array<i64: 1, 8, 256>}, {pipeline_mode = #tpu.pipeline_mode<synchronous>, transform_indices = @transform_1, window_bounds = array<i64: 3, 3, 8, 256>}, {pipeline_mode = #tpu.pipeline_mode<synchronous>, transform_indices = @transform_2, window_bounds = array<i64: 16, 8>}, {transform_indices = @transform_3, window_bounds = array<i64: 1, 16, 256>}]} {
    %c0 = arith.constant 0 : index
    %c0_0 = arith.constant 0 : index
    %c0_1 = arith.constant 0 : index
    %0 = vector.load %arg1[%c0, %c0_0, %c0_1] : memref<1x8x256xf32, #tpu.memory_space<vmem>>, vector<1x8x256xf32>
    %1 = vector.shape_cast %0 : vector<1x8x256xf32> to vector<8x256xf32>
    %2 = vector.extract_strided_slice %1 {offsets = [0, 255], sizes = [8, 1], strides = [1, 1]} : vector<8x256xf32> to vector<8x1xf32>
    %3 = vector.extract_strided_slice %1 {offsets = [0, 0], sizes = [8, 255], strides = [1, 1]} : vector<8x256xf32> to vector<8x255xf32>
    %4 = tpu.concatenate %2, %3 in 1 : vector<8x1xf32>, vector<8x255xf32> -> vector<8x256xf32>
    %5 = vector.extract_strided_slice %1 {offsets = [0, 1], sizes = [8, 255], strides = [1, 1]} : vector<8x256xf32> to vector<8x255xf32>
    %6 = vector.extract_strided_slice %1 {offsets = [0, 0], sizes = [8, 1], strides = [1, 1]} : vector<8x256xf32> to vector<8x1xf32>
    %7 = tpu.concatenate %5, %6 in 1 : vector<8x255xf32>, vector<8x1xf32> -> vector<8x256xf32>
    %c0_2 = arith.constant 0 : index
    %c0_3 = arith.constant 0 : index
    %c0_4 = arith.constant 0 : index
    %c0_5 = arith.constant 0 : index
    %8 = vector.load %arg2[%c0_2, %c0_3, %c0_4, %c0_5] : memref<3x3x8x256xf32, #tpu.memory_space<vmem>>, vector<1x1x8x256xf32>
    %9 = vector.shape_cast %8 : vector<1x1x8x256xf32> to vector<8x256xf32>
    %10 = arith.mulf %9, %4 : vector<8x256xf32>
    %c0_6 = arith.constant 0 : index
    %c1 = arith.constant 1 : index
    %c0_7 = arith.constant 0 : index
    %c0_8 = arith.constant 0 : index
    %11 = vector.load %arg2[%c0_6, %c1, %c0_7, %c0_8] : memref<3x3x8x256xf32, #tpu.memory_space<vmem>>, vector<1x1x8x256xf32>
    %12 = vector.shape_cast %11 : vector<1x1x8x256xf32> to vector<8x256xf32>
    %13 = arith.mulf %12, %1 : vector<8x256xf32>
    %14 = arith.addf %10, %13 : vector<8x256xf32>
    %c0_9 = arith.constant 0 : index
    %c2 = arith.constant 2 : index
    %c0_10 = arith.constant 0 : index
    %c0_11 = arith.constant 0 : index
    %15 = vector.load %arg2[%c0_9, %c2, %c0_10, %c0_11] : memref<3x3x8x256xf32, #tpu.memory_space<vmem>>, vector<1x1x8x256xf32>
    %16 = vector.shape_cast %15 : vector<1x1x8x256xf32> to vector<8x256xf32>
    %17 = arith.mulf %16, %7 : vector<8x256xf32>
    %18 = arith.addf %14, %17 : vector<8x256xf32>
    %19 = vector.extract_strided_slice %18 {offsets = [0, 240], sizes = [8, 16], strides = [1, 1]} : vector<8x256xf32> to vector<8x16xf32>
    %20 = vector.extract_strided_slice %18 {offsets = [0, 0], sizes = [8, 240], strides = [1, 1]} : vector<8x256xf32> to vector<8x240xf32>
    %21 = tpu.concatenate %19, %20 in 1 : vector<8x16xf32>, vector<8x240xf32> -> vector<8x256xf32>
    %c1_12 = arith.constant 1 : index
    %c0_13 = arith.constant 0 : index
    %c0_14 = arith.constant 0 : index
    %c0_15 = arith.constant 0 : index
    %22 = vector.load %arg2[%c1_12, %c0_13, %c0_14, %c0_15] : memref<3x3x8x256xf32, #tpu.memory_space<vmem>>, vector<1x1x8x256xf32>
    %23 = vector.shape_cast %22 : vector<1x1x8x256xf32> to vector<8x256xf32>
    %24 = arith.mulf %23, %4 : vector<8x256xf32>
    %c1_16 = arith.constant 1 : index
    %c1_17 = arith.constant 1 : index
    %c0_18 = arith.constant 0 : index
    %c0_19 = arith.constant 0 : index
    %25 = vector.load %arg2[%c1_16, %c1_17, %c0_18, %c0_19] : memref<3x3x8x256xf32, #tpu.memory_space<vmem>>, vector<1x1x8x256xf32>
    %26 = vector.shape_cast %25 : vector<1x1x8x256xf32> to vector<8x256xf32>
    %27 = arith.mulf %26, %1 : vector<8x256xf32>
    %28 = arith.addf %24, %27 : vector<8x256xf32>
    %c1_20 = arith.constant 1 : index
    %c2_21 = arith.constant 2 : index
    %c0_22 = arith.constant 0 : index
    %c0_23 = arith.constant 0 : index
    %29 = vector.load %arg2[%c1_20, %c2_21, %c0_22, %c0_23] : memref<3x3x8x256xf32, #tpu.memory_space<vmem>>, vector<1x1x8x256xf32>
    %30 = vector.shape_cast %29 : vector<1x1x8x256xf32> to vector<8x256xf32>
    %31 = arith.mulf %30, %7 : vector<8x256xf32>
    %32 = arith.addf %28, %31 : vector<8x256xf32>
    %33 = arith.addf %21, %32 : vector<8x256xf32>
    %c2_24 = arith.constant 2 : index
    %c0_25 = arith.constant 0 : index
    %c0_26 = arith.constant 0 : index
    %c0_27 = arith.constant 0 : index
    %34 = vector.load %arg2[%c2_24, %c0_25, %c0_26, %c0_27] : memref<3x3x8x256xf32, #tpu.memory_space<vmem>>, vector<1x1x8x256xf32>
    %35 = vector.shape_cast %34 : vector<1x1x8x256xf32> to vector<8x256xf32>
    %36 = arith.mulf %35, %4 : vector<8x256xf32>
    %c2_28 = arith.constant 2 : index
    %c1_29 = arith.constant 1 : index
    %c0_30 = arith.constant 0 : index
    %c0_31 = arith.constant 0 : index
    %37 = vector.load %arg2[%c2_28, %c1_29, %c0_30, %c0_31] : memref<3x3x8x256xf32, #tpu.memory_space<vmem>>, vector<1x1x8x256xf32>
    %38 = vector.shape_cast %37 : vector<1x1x8x256xf32> to vector<8x256xf32>
    %39 = arith.mulf %38, %1 : vector<8x256xf32>
    %40 = arith.addf %36, %39 : vector<8x256xf32>
    %c2_32 = arith.constant 2 : index
    %c2_33 = arith.constant 2 : index
    %c0_34 = arith.constant 0 : index
    %c0_35 = arith.constant 0 : index
    %41 = vector.load %arg2[%c2_32, %c2_33, %c0_34, %c0_35] : memref<3x3x8x256xf32, #tpu.memory_space<vmem>>, vector<1x1x8x256xf32>
    %42 = vector.shape_cast %41 : vector<1x1x8x256xf32> to vector<8x256xf32>
    %43 = arith.mulf %42, %7 : vector<8x256xf32>
    %44 = arith.addf %40, %43 : vector<8x256xf32>
    %45 = vector.extract_strided_slice %44 {offsets = [0, 16], sizes = [8, 240], strides = [1, 1]} : vector<8x256xf32> to vector<8x240xf32>
    %46 = vector.extract_strided_slice %44 {offsets = [0, 0], sizes = [8, 16], strides = [1, 1]} : vector<8x256xf32> to vector<8x16xf32>
    %47 = tpu.concatenate %45, %46 in 1 : vector<8x240xf32>, vector<8x16xf32> -> vector<8x256xf32>
    %48 = arith.addf %33, %47 : vector<8x256xf32>
    %c0_36 = arith.constant 0 : index
    %c0_37 = arith.constant 0 : index
    %49 = vector.load %arg3[%c0_36, %c0_37] : memref<16x8xf32, #tpu.memory_space<vmem>>, vector<16x8xf32>
    %cst = arith.constant dense<0.000000e+00> : vector<16x256xf32>
    %50 = tpu.matmul %49, %48, %cst {dimension_numbers = #tpu.dot_dimension_numbers<[1], [0], [0], [1], [0, 0, 1, 1], [], []>} : vector<16x8xf32>, vector<8x256xf32>, vector<16x256xf32> -> vector<16x256xf32>
    %c0_38 = arith.constant 0 : index
    %c0_39 = arith.constant 0 : index
    %c0_40 = arith.constant 0 : index
    %51 = vector.load %arg4[%c0_38, %c0_39, %c0_40] : memref<1x16x256xf32, #tpu.memory_space<vmem>>, vector<1x16x256xf32>
    %52 = vector.shape_cast %51 : vector<1x16x256xf32> to vector<16x256xf32>
    %53 = vector.shape_cast %50 : vector<16x256xf32> to vector<1x16x256xf32>
    tpu.vector_store %arg4[%c0_38, %c0_39, %c0_40], %53 {strides = array<i32>} : memref<1x16x256xf32, #tpu.memory_space<vmem>>, vector<1x16x256xf32>,
    return
  }
  func.func @transform_0(%arg0: i32) -> (i32, i32, i32) {
    %c0_i32 = arith.constant 0 : i32
    %c0_i32_0 = arith.constant 0 : i32
    %c0_i32_1 = arith.constant 0 : i32
    return %arg0, %c0_i32, %c0_i32_0 : i32, i32, i32
  }
  func.func @transform_1(%arg0: i32) -> (i32, i32, i32, i32) {
    %c0_i32 = arith.constant 0 : i32
    %c0_i32_0 = arith.constant 0 : i32
    %c0_i32_1 = arith.constant 0 : i32
    %c0_i32_2 = arith.constant 0 : i32
    %c0_i32_3 = arith.constant 0 : i32
    return %c0_i32, %c0_i32_0, %c0_i32_1, %c0_i32_2 : i32, i32, i32, i32
  }
  func.func @transform_2(%arg0: i32) -> (i32, i32) {
    %c0_i32 = arith.constant 0 : i32
    %c0_i32_0 = arith.constant 0 : i32
    %c0_i32_1 = arith.constant 0 : i32
    return %c0_i32, %c0_i32_0 : i32, i32
  }
  func.func @transform_3(%arg0: i32) -> (i32, i32, i32) {
    %c0_i32 = arith.constant 0 : i32
    %c0_i32_0 = arith.constant 0 : i32
    %c0_i32_1 = arith.constant 0 : i32
    return %arg0, %c0_i32, %c0_i32_0 : i32, i32, i32
  }
}

</mosaic_0001>

<bundles_post_ra>
// kernel: tpu_custom_call.1
= control target key start
LH: loop header
LB: loop body
LE: loop exit
PB: predicated region body
PF: predicated region fallthrough
CT: control target
= control target key end

     0   :  { %8 = vsyncpa [#allocation3], 0  ;;  %s957_s0 = inlined_call_operand.hbm [shape: f32[2,8,256], index: 0, kind: input, shape index: {}]   ;;  %s958_s1 = inlined_call_operand.hbm [shape: f32[3,3,8,256], index: 1, kind: input, shape index: {}]   ;;  %s959_s2 = inlined_call_operand.vmem [shape: f32[16,8], index: 2, kind: input, shape index: {}]   ;;  %s960_s3 = inlined_call_operand.hbm [shape: f32[2,16,256], index: 3, kind: output, shape index: {}]  }
   0x1   :  { %10 = vsyncpa [#allocation3 + $0x1], 0 }
   0x2   :  { %11 = vsyncpa [#allocation6], 0 }
   0x3   :  { %12 = vsyncpa [#allocation4], 0 }
   0x4   :  { %14 = vsyncpa [#allocation4 + $0x1], 0  ;;  %s745_s12 = smov 0   ;;  %s747_s13 = smov 0  }
   0x5   :  { %s749_s14 = smov 0   ;;  %s751_s15 = smov 0  }
   0x6 LB: > { %s766_s16 = sadd.s32 4294967295, %s712_s15   ;;  %s497_s17 = sadd.s32 4294967294, %s712_s15   ;;  %s712_s15 = sphi %s751_s15, %s980_s15   ;;  %s708_s14 = sphi %s749_s14, %s979_s14   ;;  %s704_s13 = sphi %s747_s13, %s978_s13   ;;  %s700_s12 = sphi %s745_s12, %s977_s12  }
   0x7   : > { %p40_p0 = scmp.ne.s32.totalorder %s704_s13, %s700_s12  ;;  %p961_p1 = scmp.eq.s32.totalorder %s766_s16, 0 }
   0x8   : > { %p112_p3 = scmp.eq.s32.totalorder %s497_s17, 1  ;;  %p498_p5 = scmp.ge.s32.totalorder %s712_s15, 1 }
   0x9   : > { %p775_p4 = por %p961_p1, %p40_p0  ;;  %p119_p7 = scmp.lt.s32.totalorder %s712_s15, 3 }
   0xa   : > { %p780_p6 = por %p112_p3, %p40_p0  ;;  %s714_s21 = smov [#allocation5]  }
   0xb   : > { %s964_s18 = scalar_select %p775_p4, 1, 0 }
   0xc   : > { %s965_s19 = scalar_select %p780_p6, 1, 0 }
   0xd   : > { %p785_p8 = pnand %p498_p5, %p119_p7  ;;  %s131_s22 = sshll.u32 %s714_s21, 4  ;;  %s789_s22 = int_to_ptr.vmem [resolvable:$true] %s131_s22 }
   0xe   : > { %s801_s24 = sadd.s32 1, %s712_s15   ;;  %s27_s25 = sadd.s32 1, %s708_s14 }
   0xf   : > { %s966_s20 = scalar_select %p785_p8, 1, 0 }
  0x10   : > { %p527_p9 = pneg %p785_p8  ;;  %s24_s26 = ssub.s32 %s712_s15, %s801_s24 }
  0x11   : > { %s584_s29 = scalar_lea.hbm %s958_s1, 2304 }
  0x12   : > { %p796_p11 = pnand %p527_p9, %p961_p1  ;;  %p585_p12 = scmp.ne.s32.totalorder %s958_s1, %s584_s29 }
  0x13   : > { %p591_p5 = scmp.lt.u32.totalorder %s584_s29, %s958_s1 }
  0x14   : > { %p586_p13 = pneg %p796_p11 }
  0x16   : > { %p587_p0 = pnand %p586_p13, %p585_p12 }
  0x18   : > { %p588_p3 = pneg %p587_p0 }
  0x1a   : > { %p593_p7 = pnand %p591_p5, %p588_p3 }
  0x1c   : > { %596 = shalt.err (!%p593_p7)
}
  0x1d   : > { %s597_s7 = scalar_lea.vmem %s789_s22, 2304  ;;  %p605_p2 = scmp.lt.s32.totalorder %s789_s22, %s789_s22 }
  0x1e   : > { %p598_p9 = scmp.ne.s32.totalorder %s789_s22, %s597_s7  ;;  %p606_p6 = scmp.lt.s32.totalorder %s597_s7, %s597_s7 }
  0x20   : > { %p600_p10 = pnand %p598_p9, %p586_p13  ;;  %p607_p4 = por %p606_p6, %p605_p2 }
  0x22   : > { %p601_p1 = pneg %p600_p10 }
  0x24   : > { %p608_p8 = pnand %p607_p4, %p601_p1 }
  0x26   : > { %611 = shalt.err (!%p608_p8)
}
  0x27   : > { %s715_s8 = smov 256   ;;  %s716_s9 = smov 16  }
  0x28   : > { %530 = dma.hbm_to_vmem [thread:$0]  (!%p796_p11), %s958_s1, 2304, %s789_s22, [#allocation6], %s715_s8, %s715_s8, %s716_s9  }
  0x29   : > { %p25_p2 = scmp.eq.s32.totalorder %s24_s26, 0  ;;  %p34_p1 = scmp.ne.s32.totalorder %s708_s14, %s704_s13 }
  0x2a   : > { %p35_p4 = scmp.eq.s32.totalorder %s712_s15, 0  ;;  %p540_p6 = scmp.lt.s32.totalorder %s712_s15, 2 }
  0x2b   : > { %s832_s17 = scalar_select %p25_p2, %s708_s14, %s27_s25  }
  0x2c   : > { %p36_p8 = por %p35_p4, %p34_p1  ;;  %p968_p10 = scmp.eq.s32.totalorder %s766_s16, 1 }
  0x2d   : > { %s148_s27 = sand.u32 1, %s708_s14   ;;  %s515_s28 = sshll.u32 %s712_s15, 8 }
  0x2e   : > { %p836_p12 = por %p968_p10, %p34_p1  ;;  %s501_s29 = sshll.u32 %s148_s27, 4 }
  0x2f   : > { %s845_s4 = scalar_lea.hbm %s957_s0, %s515_s28  ;;  %s152_s22 = scalar_lea.vmem [#allocation2], %s501_s29 }
  0x30   : > { %s160_s25 = sshll.u32 %s152_s22, 4  ;;  %p847_p11 = pnand %p540_p6, %p36_p8  ;;  %s851_s25 = int_to_ptr.vmem [resolvable:$true] %s160_s25 }
  0x31   : > { %s149_s5 = scalar_lea.sflag [#allocation3], %s148_s27  ;;  %s612_s6 = scalar_lea.hbm %s845_s4, 256 }
  0x32   : > { %p613_p13 = scmp.ne.s32.totalorder %s845_s4, %s612_s6  ;;  %p614_p0 = pneg %p847_p11 }
  0x33   : > { %s617_s9 = scalar_lea.hbm %s957_s0, 512  ;;  %p618_p7 = scmp.lt.u32.totalorder %s845_s4, %s957_s0 }
  0x34   : > { %p615_p3 = pnand %p614_p0, %p613_p13  ;;  %p619_p9 = scmp.lt.u32.totalorder %s617_s9, %s612_s6 }
  0x35   : > { %p621_p1 = scmp.lt.u32.totalorder %s612_s6, %s845_s4 }
  0x36   : > { %p616_p5 = pneg %p615_p3  ;;  %p620_p2 = por %p619_p9, %p618_p7 }
  0x38   : > { %p622_p4 = por %p621_p1, %p620_p2 }
  0x3a   : > { %p623_p6 = pnand %p622_p4, %p616_p5 }
  0x3c   : > { %626 = shalt.err (!%p623_p6)
}
  0x3d   : > { %s627_s27 = scalar_lea.vmem %s851_s25, 256  ;;  %s717_s28 = smov [#allocation2]  }
  0x3e   : > { %p628_p8 = scmp.ne.s32.totalorder %s851_s25, %s627_s27  ;;  %s632_s29 = sshll.u32 %s717_s28, 4  ;;  %s633_s29 = int_to_ptr.vmem [resolvable:$false] %s632_s29 }
  0x3f   : > { %s634_s23 = scalar_lea.vmem %s633_s29, 512  ;;  %p635_p3 = scmp.lt.s32.totalorder %s851_s25, %s633_s29 }
  0x40   : > { %p630_p10 = pnand %p628_p8, %p614_p0  ;;  %p636_p7 = scmp.lt.s32.totalorder %s634_s23, %s627_s27 }
  0x42   : > { %p631_p13 = pneg %p630_p10  ;;  %p637_p9 = por %p636_p7, %p635_p3 }
  0x44   : > { %p638_p2 = pnand %p637_p9, %p631_p13 }
  0x46   : > { %641 = shalt.err (!%p638_p2)
}
  0x47   : > { %534 = dma.hbm_to_vmem [thread:$0]  (!%p847_p11), %s845_s4, 256, %s851_s25, %s149_s5  }
  0x48   : > { %p971_p5 = scmp.ne.s32.totalorder %s966_s20, 0 }
  0x49   : > { %s881_s30 = sand.u32 (!%p971_p5), 1, %s704_s13   ;;  %p972_p0 = scmp.ne.s32.totalorder (!%p971_p5), %s964_s18, 0 }
  0x4a   : > { %169 = sbr.rel (%p971_p5) target bundleno = 564 (0x234), region = 32  ;;  %s505_s22 = sshll.u32 (!%p971_p5), %s881_s30, 4 }
  0x4b   : > { %s172_s6 = scalar_lea.sflag (!%p971_p5), [#allocation3], %s881_s30  ;;  %s175_s7 = scalar_lea.vmem (!%p971_p5), [#allocation2], %s505_s22 }
  0x51   : > { %687 = dma.done.wait (%p972_p0), %s172_s6, 256  }
  0x52   : > { %689 = vsyncadd (%p972_p0), %s172_s6, 4294967040  ;;  %p973_p1 = scmp.eq.s32.totalorder %s766_s16, 0 }
  0x54   : > { %691 = dma.done.wait (%p973_p1), [#allocation6], 2304   ;;  %p974_p11 = pmov %p973_p1 }
  0x55   : > { %v203_v0 = vld [vmem:[%s175_s7 + $0x8] sm:$0xff]  ;;  %v202_v1 = vld [vmem:[%s175_s7] sm:$0xff]  ;;  %s718_s20 = smov 1   ;;  %s719_s4 = smov 127   ;;  %vm220_vm0 = vcmask 1039360   ;;  %vm211_vm1 = vcmask 7168  }
  0x56   : > { %693 = vsyncadd (%p974_p11), [#allocation6], 4294964992  ;;  %205 = vrot.lane.b32.xlu0 %v203_v0, %s718_s20  ;;  %216 = vrot.lane.b32.xlu1 %v202_v1, %s719_s4  ;;  %v232_v4 = vld [vmem:[#allocation5 + $0x18] sm:$0xff]  ;;  %v238_v5 = vld [vmem:[#allocation5 + $0x20] sm:$0xff]  ;;  %v720_v48 = vmov 0.0   ;;  %s721_s18 = smov 16  }
  0x57   : > { %v226_v6 = vld [vmem:[#allocation5] sm:$0xff]  ;;  %v231_v7 = vld [vmem:[#allocation5 + $0x10] sm:$0xff]  ;;  %v263_v9 = vld [vmem:[#allocation5 + $0x48] sm:$0xff]  ;;  %v234_v15 = vmul.f32 %v232_v4, %v203_v0  ;;  %383 = vmatprep.mubr.f32.mxu0 %v720_v48  ;;  %389 = vmatprep.mubr.f32.mxu1 %v720_v48  ;;  %s722_s25 = smov 112   ;;  %vm251_vm2 = vcmask 130048   ;;  %vm302_vm3 = vcmask 916480  }
  0x58   : > { %v262_v8 = vld [vmem:[#allocation5 + $0x40] sm:$0xff]  ;;  %v283_v10 = vld [vmem:[#allocation5 + $0x70] sm:$0xff]  ;;  %v227_v12 = vld [vmem:[#allocation5 + $0x8] sm:$0xff]  ;;  %v233_v23 = vmul.f32 %v231_v7, %v202_v1  ;;  %v265_v26 = vmul.f32 %v263_v9, %v203_v0  ;;  %vm312_vm4 = vcmask 64512   ;;  %s507_s10 = sshll.u32 %s881_s30, 5  ;;  %s516_s28 = sshll.u32 %s766_s16, 9 }
  0x59   : > { %v257_v13 = vld [vmem:[#allocation5 + $0x30] sm:$0xff]  ;;  %v284_v16 = vld [vmem:[#allocation5 + $0x78] sm:$0xff]  ;;  %v278_v19 = vld [vmem:[#allocation5 + $0x60] sm:$0xff]  ;;  %v264_v27 = vmul.f32 %v262_v8, %v202_v1  ;;  %v285_v28 = vmul.f32 %v283_v10, %v202_v1  ;;  %s201_s11 = scalar_lea.vmem [#allocation7], %s507_s10  ;;  %s912_s22 = scalar_lea.hbm %s960_s3, %s516_s28 }
  0x5a   : > { %218 = vrot.lane.b32.xlu1 %v203_v0, %s719_s4  ;;  %209 = vrot.lane.b32.xlu0 %v202_v1, %s718_s20  ;;  %v258_v18 = vld [vmem:[#allocation5 + $0x38] sm:$0xff]  ;;  %v279_v20 = vld [vmem:[#allocation5 + $0x68] sm:$0xff]  ;;  %v269_v29 = vld [vmem:[#allocation5 + $0x50] sm:$0xff]  ;;  %v286_v34 = vmul.f32 %v284_v16, %v203_v0  ;;  %s414_s27 = sshll.u32 %s201_s11, 4  ;;  %s401_s6 = scalar_lea.sflag [#allocation4], %s881_s30  ;;  %s907_s27 = int_to_ptr.vmem [resolvable:$true] %s414_s27 }
  0x5b   : > { %v239_v24 = vld [vmem:[#allocation5 + $0x28] sm:$0xff]  ;;  %v270_v30 = vld [vmem:[#allocation5 + $0x58] sm:$0xff]  ;;  %v290_v42 = vld [vmem:[#allocation5 + $0x80] sm:$0xff]  ;;  %s642_s16 = scalar_lea.vmem %s907_s27, 512  ;;  %s723_s7 = smov [#allocation7]  }
  0x5c   : > { %v291_v43 = vld [vmem:[#allocation5 + $0x88] sm:$0xff]  ;;  %v310_v7 = vld [vmem:[%s959_s2] sm:$0xff]  ;;  %p643_p4 = scmp.ne.s32.totalorder %s907_s27, %s642_s16  ;;  %s646_s20 = sshll.u32 %s723_s7, 4  ;;  %s647_s20 = int_to_ptr.vmem [resolvable:$false] %s646_s20 }
  0x5d   : > { %v311_v8 = vld [vmem:[%s959_s2 + $0x8] sm:$0xff]  ;;  %s648_s4 = scalar_lea.vmem %s647_s20, 1024  ;;  %p649_p10 = scmp.lt.s32.totalorder %s907_s27, %s647_s20 }
  0x5e   : > { %p644_p6 = pnand %p643_p4, %p836_p12  ;;  %p650_p13 = scmp.lt.s32.totalorder %s648_s4, %s642_s16 }
  0x60   : > { %p645_p8 = pneg %p644_p6  ;;  %p651_p3 = por %p650_p13, %p649_p10 }
  0x62   : > { %p652_p7 = pnand %p651_p3, %p645_p8 }
  0xc8   : > { %v206_v2 = vpop.permute.xlu0 %205  ;;  %v217_v3 = vpop.permute.xlu1 %216 }
  0xcc   : > { %v219_v11 = vpop.permute.xlu1 %218  ;;  %v210_v14 = vpop.permute.xlu0 %209 }
  0xcd   : > { %v221_v17 = vsel %vm220_vm0, %v217_v3, %v219_v11  ;;  %v212_v21 = vsel %vm211_vm1, %v210_v14, %v206_v2  ;;  %v215_v22 = vsel %vm211_vm1, %v206_v2, %v210_v14  ;;  %v225_v25 = vsel %vm220_vm0, %v219_v11, %v217_v3 }
  0xce   : > { %v240_v31 = vmul.f32 %v238_v5, %v221_v17  ;;  %v228_v32 = vmul.f32 %v226_v6, %v215_v22  ;;  %v229_v33 = vmul.f32 %v227_v12, %v212_v21  ;;  %v259_v35 = vmul.f32 %v257_v13, %v215_v22 }
  0xcf   : > { %v260_v36 = vmul.f32 %v258_v18, %v212_v21  ;;  %v280_v37 = vmul.f32 %v278_v19, %v215_v22  ;;  %v281_v38 = vmul.f32 %v279_v20, %v212_v21  ;;  %v241_v39 = vmul.f32 %v239_v24, %v225_v25 }
  0xd0   : > { %v236_v40 = vadd.f32 %v234_v15, %v229_v33  ;;  %v235_v41 = vadd.f32 %v233_v23, %v228_v32  ;;  %v271_v44 = vmul.f32 %v269_v29, %v221_v17  ;;  %v272_v45 = vmul.f32 %v270_v30, %v225_v25 }
  0xd1   : > { %v266_v46 = vadd.f32 %v264_v27, %v259_v35  ;;  %v267_v47 = vadd.f32 %v265_v26, %v260_v36  ;;  %v287_v51 = vadd.f32 %v285_v28, %v280_v37  ;;  %v288_v52 = vadd.f32 %v286_v34, %v281_v38 }
  0xd2   : > { %v243_v49 = vadd.f32 %v241_v39, %v236_v40  ;;  %v242_v50 = vadd.f32 %v240_v31, %v235_v41  ;;  %v292_v55 = vmul.f32 %v290_v42, %v221_v17  ;;  %v293_v56 = vmul.f32 %v291_v43, %v225_v25 }
  0xd3   : > { %v273_v53 = vadd.f32 %v271_v44, %v266_v46  ;;  %v274_v54 = vadd.f32 %v272_v45, %v267_v47 }
  0xd4   : > { %245 = vrot.lane.b32.xlu0 %v243_v49, %s721_s18  ;;  %249 = vrot.lane.b32.xlu1 %v242_v50, %s721_s18  ;;  %v294_v57 = vadd.f32 %v292_v55, %v287_v51  ;;  %v295_v58 = vadd.f32 %v293_v56, %v288_v52 }
  0xd8   : > { %298 = vrot.lane.b32.xlu0 %v294_v57, %s722_s25  ;;  %300 = vrot.lane.b32.xlu1 %v295_v58, %s722_s25 }
 0x146   : > { %v246_v59 = vpop.permute.xlu0 %245  ;;  %v250_v60 = vpop.permute.xlu1 %249 }
 0x147   : > { %v252_v61 = vsel %vm251_vm2, %v250_v60, %v246_v59  ;;  %v255_v62 = vsel %vm251_vm2, %v246_v59, %v250_v60 }
 0x148   : > { %v275_v63 = vadd.f32 %v273_v53, %v255_v62  ;;  %v276_v0 = vadd.f32 %v274_v54, %v252_v61 }
 0x14a   : > { %v299_v1 = vpop.permute.xlu0 %298  ;;  %v301_v2 = vpop.permute.xlu1 %300 }
 0x14b   : > { %v303_v3 = vsel %vm302_vm3, %v299_v1, %v301_v2  ;;  %v307_v4 = vsel %vm302_vm3, %v301_v2, %v299_v1 }
 0x14c   : > { %v309_v5 = vadd.f32 %v307_v4, %v276_v0  ;;  %v308_v6 = vadd.f32 %v303_v3, %v275_v63 }
 0x14e   : > { %319 = vmatprep.subr.mxu0 %v309_v5  ;;  %517 = vmatprep.subr.mxu1 %v309_v5 }
 0x14f   : > { %320 = vmatpush1.msra.mxu0 %v308_v6  ;;  %518 = vmatpush1.msra.mxu1 %v308_v6 }
 0x150   : > { %508 = vmatmul.mubr.msk.f32.vlgmr.msra.gmra.mrb[0].mxu0 %vm312_vm4, %v310_v7  ;;  %509 = vmatmul.mubr.msk.f32.vlgmr.msra.gmra.mrb[0].mxu1 %vm312_vm4, %v311_v8 }
 0x223   : > { %v385_v9 = vpop.f32.mrb[0].mxu0  ;;  %v391_v10 = vpop.f32.mrb[0].mxu1 }
 0x224   : > { %396 = vst [vmem:[%s201_s11] sm:$0xff] %v385_v9  ;;  %398 = vst [vmem:[%s201_s11 + $0x10] sm:$0xff] %v391_v10  ;;  %v387_v11 = vpop.f32.mrb[1].mxu0  ;;  %v393_v12 = vpop.f32.mrb[1].mxu1 }
 0x225   : > { %397 = vst [vmem:[%s201_s11 + $0x8] sm:$0xff] %v387_v11  ;;  %399 = vst [vmem:[%s201_s11 + $0x18] sm:$0xff] %v393_v12 }
 0x226   : > { %655 = shalt.err (!%p652_p7)
}
 0x227   : > { %s656_s25 = scalar_lea.hbm %s912_s22, 512  ;;  %s660_s8 = scalar_lea.hbm %s960_s3, 1024 }
 0x228   : > { %p657_p9 = scmp.ne.s32.totalorder %s912_s22, %s656_s25  ;;  %p661_p0 = scmp.lt.u32.totalorder %s912_s22, %s960_s3 }
 0x229   : > { %p662_p1 = scmp.lt.u32.totalorder %s660_s8, %s656_s25  ;;  %p664_p4 = scmp.lt.u32.totalorder %s656_s25, %s912_s22 }
 0x22a   : > { %p658_p2 = pnand %p657_p9, %p836_p12 }
 0x22b   : > { %p663_p11 = por %p662_p1, %p661_p0 }
 0x22c   : > { %p659_p5 = pneg %p658_p2 }
 0x22d   : > { %p665_p6 = por %p664_p4, %p663_p11 }
 0x22f   : > { %p666_p8 = pnand %p665_p6, %p659_p5 }
 0x231   : > { %669 = shalt.err (!%p666_p8)
}
 0x232   : > { %s724_s11 = smov 256  }
 0x233   : > { %525 = dma.vmem_to_hbm [thread:$0]  (%p836_p12), %s907_s27, 512, %s912_s22, %s401_s6, %s724_s11, %s724_s11, %s721_s18  }
 0x234 PF: > { %s429_s28 = sand.u32 1, %s700_s12   ;;  %p975_p10 = scmp.ne.s32.totalorder %s965_s19, 0 }
 0x235   : > { %p976_p13 = scmp.ge.s32.totalorder %s712_s15, 2  ;;  %s430_s29 = scalar_lea.sflag [#allocation4], %s429_s28 }
 0x237   : > { %p536_p3 = pnand %p976_p13, %p975_p10 }
 0x239   : > { %695 = dma.done.wait (!%p536_p3), %s430_s29, 512  }
 0x23a   : > { %697 = vsyncadd (!%p536_p3), %s430_s29, 4294966784  ;;  %p17_p7 = scmp.ge.s32.totalorder %s801_s24, 4   ;;  %s977_s12 = smov %s704_s13 }
 0x23b   : > { %s978_s13 = smov %s708_s14  ;;  %s979_s14 = smov %s832_s17 }
 0x23c   : > { %s980_s15 = smov %s801_s24  ;;  %19 = sbr.rel (!%p17_p7) target bundleno = 6 (0x6), region = 89 }
 0x243   :  { %435 = vsyncpa [#allocation3], 1 }
 0x244   :  { %437 = vsyncpa [#allocation3 + $0x1], 1 }
 0x245   :  { %438 = vsyncpa [#allocation6], 1 }
 0x246   :  { %439 = vsyncpa [#allocation4], 1 }
 0x247   :  { %441 = vsyncpa [#allocation4 + $0x1], 1 }

</bundles_post_ra>
